<compile_context>
chip_gen: v5e
topology: v5e:2x2
jax: 0.10.0
libtpu: 0.0.40
codegen_flags: <defaults>
</compile_context>

<pallas_src>
import jax
import jax.numpy as jnp
from jax.experimental import pallas as pl
from jax.experimental.pallas import tpu as pltpu

_LANE = 128          # lane width (last-dim alignment for f32/bf16)
_BF16_SUBLANE = 16   # sublane packing for bf16 (second-to-last dim alignment)


def _round_up(n, m):
    return ((n + m - 1) // m) * m


def _qnet_kernel(x_ref, w1_ref, b1_ref, w2_ref, b2_ref, w3_ref, b3_ref, o_ref):
    # x arrives already bf16 (cast once in the wrapper).  Matmul operands are
    # bf16 (MXU rate on v6e/v7x), accumulation + bias-add + ReLU are f32
    # (v5e's VPU has no bf16).
    x = x_ref[...]

    # linear1 + relu   (K = padded input features, only 16)
    h = jnp.dot(x, w1_ref[...], preferred_element_type=jnp.float32) + b1_ref[...]
    h = jnp.maximum(h, 0.0)

    # linear2 + relu
    h = jnp.dot(h.astype(jnp.bfloat16), w2_ref[...],
                preferred_element_type=jnp.float32) + b2_ref[...]
    h = jnp.maximum(h, 0.0)

    # linear3 (no activation)
    out = jnp.dot(h.astype(jnp.bfloat16), w3_ref[...],
                  preferred_element_type=jnp.float32) + b3_ref[...]
    o_ref[...] = out.astype(o_ref.dtype)


def init_params(key, input_size, hidden_size, output_size):
    """Deterministic PyTorch-style (uniform +/- 1/sqrt(fan_in)) init, f32."""
    ks = jax.random.split(key, 6)

    def uniform(k, shape, fan_in):
        bound = 1.0 / jnp.sqrt(jnp.float32(fan_in))
        return jax.random.uniform(k, shape, jnp.float32, -bound, bound)

    return {
        # stored as (in_features, out_features) so the kernel does x @ W
        "w1": uniform(ks[0], (input_size, hidden_size), input_size),
        "b1": uniform(ks[1], (1, hidden_size), input_size),
        "w2": uniform(ks[2], (hidden_size, hidden_size), hidden_size),
        "b2": uniform(ks[3], (1, hidden_size), hidden_size),
        "w3": uniform(ks[4], (hidden_size, output_size), hidden_size),
        "b3": uniform(ks[5], (1, output_size), hidden_size),
    }


def prepare_params(params):
    """Pad feature dims (hidden/output -> 128 lanes, input -> 16 sublanes) and
    cast weights to bf16.  Done once, outside the per-step path.
    Returns (padded_params, logical_output_size)."""
    w1, b1 = params["w1"], params["b1"]
    w2, b2 = params["w2"], params["b2"]
    w3, b3 = params["w3"], params["b3"]

    in_p = _round_up(w1.shape[0], _BF16_SUBLANE)   # NOT 128: keep x stream thin
    h_p = _round_up(w1.shape[1], _LANE)
    out_p = _round_up(w3.shape[1], _LANE)

    def pad2(a, rows, cols):
        return jnp.pad(a, ((0, rows - a.shape[0]), (0, cols - a.shape[1])))

    padded = {
        "w1": pad2(w1, in_p, h_p).astype(jnp.bfloat16),
        "b1": pad2(b1, 1, h_p).astype(jnp.float32),
        "w2": pad2(w2, h_p, h_p).astype(jnp.bfloat16),
        "b2": pad2(b2, 1, h_p).astype(jnp.float32),
        "w3": pad2(w3, h_p, out_p).astype(jnp.bfloat16),
        "b3": pad2(b3, 1, out_p).astype(jnp.float32),
    }
    return padded, w3.shape[1]


def linear_qnet_forward(x, padded_params, out_features, *, block_b=2048,
                        min_pallas_batch=128, out_dtype=jnp.bfloat16):
    """Fused 3-layer MLP forward.

    x:               (B, in_features) — replay-buffer minibatches are the
                     intended Pallas regime; tiny batches take the XLA path.
    padded_params:   output of prepare_params().
    out_features:    logical output size (columns to keep).
    block_b:         max batch tile rows (amortizes per-grid-step overhead).
    min_pallas_batch: below this, skip pallas_call (dispatch overhead dominates).
    out_dtype:       bf16 by default (halves writeback; TD-loss/argmax safe).
    """
    w1, b1 = padded_params["w1"], padded_params["b1"]
    w2, b2 = padded_params["w2"], padded_params["b2"]
    w3, b3 = padded_params["w3"], padded_params["b3"]

    in_p, h_p = w1.shape
    out_p = w3.shape[1]
    B, in_features = x.shape

    x_bf16 = x.astype(jnp.bfloat16)

    # ---- tiny-batch fast path: plain XLA, same math/precision as the kernel.
    if B < min_pallas_batch:
        h = jnp.maximum(
            jnp.dot(x_bf16, w1[:in_features, :],
                    preferred_element_type=jnp.float32) + b1, 0.0)
        h = jnp.maximum(
            jnp.dot(h.astype(jnp.bfloat16), w2,
                    preferred_element_type=jnp.float32) + b2, 0.0)
        out = jnp.dot(h.astype(jnp.bfloat16), w3,
                      preferred_element_type=jnp.float32) + b3
        return out[:, :out_features].astype(out_dtype)

    # ---- batch tiling: multiple of 16 (bf16 sublanes), capped at block_b,
    # and small enough to give >= 2 grid steps so v7x's two TensorCores both
    # get work ("parallel" axis).  No-op on v5e/v6e.
    tb_cap = _round_up(min(block_b, B), _BF16_SUBLANE)
    tb_half = _round_up(pl.cdiv(B, 2), _BF16_SUBLANE)
    tb = max(_BF16_SUBLANE, min(tb_cap, tb_half))
    b_p = _round_up(B, tb)

    # Zero-pad batch rows and input features (exact: zeros contribute zero).
    x_p = jnp.pad(x_bf16, ((0, b_p - B), (0, in_p - in_features)))

    grid = (b_p // tb,)

    def batch_spec(shape):
        return pl.BlockSpec(shape, lambda i: (i, 0))

    def resident_spec(shape):
        # Same block for every grid step -> weights/biases stay VMEM-resident.
        return pl.BlockSpec(shape, lambda i: (0, 0))

    out_padded = pl.pallas_call(
        _qnet_kernel,
        out_shape=jax.ShapeDtypeStruct((b_p, out_p), out_dtype),
        grid=grid,
        in_specs=[
            batch_spec((tb, in_p)),       # x tile (thin: in_p = 16)
            resident_spec((in_p, h_p)),   # w1
            resident_spec((1, h_p)),      # b1
            resident_spec((h_p, h_p)),    # w2
            resident_spec((1, h_p)),      # b2
            resident_spec((h_p, out_p)),  # w3
            resident_spec((1, out_p)),    # b3
        ],
        out_specs=batch_spec((tb, out_p)),
        compiler_params=pltpu.CompilerParams(
            # batch tiles are independent -> shard across v7x's 2 TensorCores
            dimension_semantics=("parallel",),
        ),
    )(x_p, w1, b1, w2, b2, w3, b3)

    return out_padded[:B, :out_features]


def reference_forward(x, params):
    """Matched-precision pure-JAX reference: bf16 matmul operands, f32
    accumulation and f32 elementwise (same as the kernel, before the final
    output cast)."""
    def lin(a, w, b):
        return jnp.dot(a.astype(jnp.bfloat16), w.astype(jnp.bfloat16),
                       preferred_element_type=jnp.float32) + b

    h = jnp.maximum(lin(x, params["w1"], params["b1"]), 0.0)
    h = jnp.maximum(lin(h, params["w2"], params["b2"]), 0.0)
    return lin(h, params["w3"], params["b3"])


# TODO(synk): the PyTorch module's save()/load() (torch file I/O) have no
# Pallas equivalent and are intentionally not implemented.

if __name__ == "__main__":
    # Snake-RL Q-net shapes: state dim 11, hidden 32, 3 actions.
    input_size, hidden_size, output_size = 11, 32, 3

    key = jax.random.PRNGKey(0)
    k_x, k_p, k_xl, k_xm = jax.random.split(key, 4)

    params = init_params(k_p, input_size, hidden_size, output_size)
    padded_params, out_features = prepare_params(params)

    def check(out, ref, batch, tag):
        assert out.shape == (batch, output_size), (tag, out.shape)
        err = float(jnp.max(jnp.abs(out.astype(jnp.float32) - ref)))
        assert err < 2e-2, (tag, err)

    # 1) Single-inference-style tiny batch -> XLA fast path.
    batch = 8
    x = jax.random.uniform(k_x, (batch, input_size), jnp.float32)
    out = jax.block_until_ready(linear_qnet_forward(x, padded_params, out_features))
    check(out, reference_forward(x, params), batch, "fast_path")

    # 2) Replay-buffer minibatch (non-multiple-of-16) -> Pallas kernel,
    #    2-step batch grid (v7x megacore), padded batch rows sliced away.
    big_batch = 300
    x_big = jax.random.uniform(k_xl, (big_batch, input_size), jnp.float32)
    out_big = jax.block_until_ready(
        linear_qnet_forward(x_big, padded_params, out_features))
    check(out_big, reference_forward(x_big, params), big_batch, "pallas_replay")

    # 3) Force the Pallas path on a small ragged batch to exercise the
    #    batch-padding / tiling edge cases.
    mid_batch = 40
    x_mid = jax.random.uniform(k_xm, (mid_batch, input_size), jnp.float32)
    out_mid = jax.block_until_ready(
        linear_qnet_forward(x_mid, padded_params, out_features,
                            min_pallas_batch=0, block_b=32))
    check(out_mid, reference_forward(x_mid, params), mid_batch, "pallas_small")

    print("KERNEL_OK")
</pallas_src>

<mosaic_0001>
module attributes {stable_mosaic.version = 11 : i64} {
  func.func @_qnet_kernel(%arg0: i32, %arg1: memref<160x16xbf16, #tpu.memory_space<vmem>>, %arg2: memref<16x128xbf16, #tpu.memory_space<vmem>>, %arg3: memref<1x128xf32, #tpu.memory_space<vmem>>, %arg4: memref<128x128xbf16, #tpu.memory_space<vmem>>, %arg5: memref<1x128xf32, #tpu.memory_space<vmem>>, %arg6: memref<128x128xbf16, #tpu.memory_space<vmem>>, %arg7: memref<1x128xf32, #tpu.memory_space<vmem>>, %arg8: memref<160x128xbf16, #tpu.memory_space<vmem>>) attributes {dimension_semantics = [#tpu.dimension_semantics<parallel>], iteration_bounds = array<i64: 2>, scalar_prefetch = 0 : i64, scratch_operands = 0 : i64, tpu.core_type = #tpu.core_type<tc>, window_params = [{transform_indices = @transform_0, window_bounds = array<i64: 160, 16>}, {pipeline_mode = #tpu.pipeline_mode<synchronous>, transform_indices = @transform_1, window_bounds = array<i64: 16, 128>}, {pipeline_mode = #tpu.pipeline_mode<synchronous>, transform_indices = @transform_2, window_bounds = array<i64: 1, 128>}, {pipeline_mode = #tpu.pipeline_mode<synchronous>, transform_indices = @transform_3, window_bounds = array<i64: 128, 128>}, {pipeline_mode = #tpu.pipeline_mode<synchronous>, transform_indices = @transform_4, window_bounds = array<i64: 1, 128>}, {pipeline_mode = #tpu.pipeline_mode<synchronous>, transform_indices = @transform_5, window_bounds = array<i64: 128, 128>}, {pipeline_mode = #tpu.pipeline_mode<synchronous>, transform_indices = @transform_6, window_bounds = array<i64: 1, 128>}, {transform_indices = @transform_7, window_bounds = array<i64: 160, 128>}]} {
    %c0 = arith.constant 0 : index
    %c0_0 = arith.constant 0 : index
    %0 = vector.load %arg1[%c0, %c0_0] : memref<160x16xbf16, #tpu.memory_space<vmem>>, vector<160x16xbf16>
    %c0_1 = arith.constant 0 : index
    %c0_2 = arith.constant 0 : index
    %1 = vector.load %arg2[%c0_1, %c0_2] : memref<16x128xbf16, #tpu.memory_space<vmem>>, vector<16x128xbf16>
    %cst = arith.constant dense<0.000000e+00> : vector<160x128xf32>
    %2 = tpu.matmul %0, %1, %cst {dimension_numbers = #tpu.dot_dimension_numbers<[1], [0], [0], [1], [0, 0, 1, 1], [], []>} : vector<160x16xbf16>, vector<16x128xbf16>, vector<160x128xf32> -> vector<160x128xf32>
    %c0_3 = arith.constant 0 : index
    %c0_4 = arith.constant 0 : index
    %3 = vector.load %arg3[%c0_3, %c0_4] : memref<1x128xf32, #tpu.memory_space<vmem>>, vector<1x128xf32>
    %4 = vector.broadcast %3 : vector<1x128xf32> to vector<160x128xf32>
    %5 = arith.addf %2, %4 : vector<160x128xf32>
    %cst_5 = arith.constant 0.000000e+00 : f32
    %6 = vector.broadcast %cst_5 : f32 to vector<160x128xf32>
    %7 = arith.maximumf %5, %6 : vector<160x128xf32>
    %8 = arith.truncf %7 : vector<160x128xf32> to vector<160x128xbf16>
    %c0_6 = arith.constant 0 : index
    %c0_7 = arith.constant 0 : index
    %9 = vector.load %arg4[%c0_6, %c0_7] : memref<128x128xbf16, #tpu.memory_space<vmem>>, vector<128x128xbf16>
    %cst_8 = arith.constant dense<0.000000e+00> : vector<160x128xf32>
    %10 = tpu.matmul %8, %9, %cst_8 {dimension_numbers = #tpu.dot_dimension_numbers<[1], [0], [0], [1], [0, 0, 1, 1], [], []>} : vector<160x128xbf16>, vector<128x128xbf16>, vector<160x128xf32> -> vector<160x128xf32>
    %c0_9 = arith.constant 0 : index
    %c0_10 = arith.constant 0 : index
    %11 = vector.load %arg5[%c0_9, %c0_10] : memref<1x128xf32, #tpu.memory_space<vmem>>, vector<1x128xf32>
    %12 = vector.broadcast %11 : vector<1x128xf32> to vector<160x128xf32>
    %13 = arith.addf %10, %12 : vector<160x128xf32>
    %cst_11 = arith.constant 0.000000e+00 : f32
    %14 = vector.broadcast %cst_11 : f32 to vector<160x128xf32>
    %15 = arith.maximumf %13, %14 : vector<160x128xf32>
    %16 = arith.truncf %15 : vector<160x128xf32> to vector<160x128xbf16>
    %c0_12 = arith.constant 0 : index
    %c0_13 = arith.constant 0 : index
    %17 = vector.load %arg6[%c0_12, %c0_13] : memref<128x128xbf16, #tpu.memory_space<vmem>>, vector<128x128xbf16>
    %cst_14 = arith.constant dense<0.000000e+00> : vector<160x128xf32>
    %18 = tpu.matmul %16, %17, %cst_14 {dimension_numbers = #tpu.dot_dimension_numbers<[1], [0], [0], [1], [0, 0, 1, 1], [], []>} : vector<160x128xbf16>, vector<128x128xbf16>, vector<160x128xf32> -> vector<160x128xf32>
    %c0_15 = arith.constant 0 : index
    %c0_16 = arith.constant 0 : index
    %19 = vector.load %arg7[%c0_15, %c0_16] : memref<1x128xf32, #tpu.memory_space<vmem>>, vector<1x128xf32>
    %20 = vector.broadcast %19 : vector<1x128xf32> to vector<160x128xf32>
    %21 = arith.addf %18, %20 : vector<160x128xf32>
    %22 = arith.truncf %21 : vector<160x128xf32> to vector<160x128xbf16>
    %c0_17 = arith.constant 0 : index
    %c0_18 = arith.constant 0 : index
    %23 = vector.load %arg8[%c0_17, %c0_18] : memref<160x128xbf16, #tpu.memory_space<vmem>>, vector<160x128xbf16>
    tpu.vector_store %arg8[%c0_17, %c0_18], %22 {strides = array<i32>} : memref<160x128xbf16, #tpu.memory_space<vmem>>, vector<160x128xbf16>,
    return
  }
  func.func @transform_0(%arg0: i32) -> (i32, i32) {
    %c0_i32 = arith.constant 0 : i32
    %c0_i32_0 = arith.constant 0 : i32
    return %arg0, %c0_i32 : i32, i32
  }
  func.func @transform_1(%arg0: i32) -> (i32, i32) {
    %c0_i32 = arith.constant 0 : i32
    %c0_i32_0 = arith.constant 0 : i32
    %c0_i32_1 = arith.constant 0 : i32
    return %c0_i32, %c0_i32_0 : i32, i32
  }
  func.func @transform_2(%arg0: i32) -> (i32, i32) {
    %c0_i32 = arith.constant 0 : i32
    %c0_i32_0 = arith.constant 0 : i32
    %c0_i32_1 = arith.constant 0 : i32
    return %c0_i32, %c0_i32_0 : i32, i32
  }
  func.func @transform_3(%arg0: i32) -> (i32, i32) {
    %c0_i32 = arith.constant 0 : i32
    %c0_i32_0 = arith.constant 0 : i32
    %c0_i32_1 = arith.constant 0 : i32
    return %c0_i32, %c0_i32_0 : i32, i32
  }
  func.func @transform_4(%arg0: i32) -> (i32, i32) {
    %c0_i32 = arith.constant 0 : i32
    %c0_i32_0 = arith.constant 0 : i32
    %c0_i32_1 = arith.constant 0 : i32
    return %c0_i32, %c0_i32_0 : i32, i32
  }
  func.func @transform_5(%arg0: i32) -> (i32, i32) {
    %c0_i32 = arith.constant 0 : i32
    %c0_i32_0 = arith.constant 0 : i32
    %c0_i32_1 = arith.constant 0 : i32
    return %c0_i32, %c0_i32_0 : i32, i32
  }
  func.func @transform_6(%arg0: i32) -> (i32, i32) {
    %c0_i32 = arith.constant 0 : i32
    %c0_i32_0 = arith.constant 0 : i32
    %c0_i32_1 = arith.constant 0 : i32
    return %c0_i32, %c0_i32_0 : i32, i32
  }
  func.func @transform_7(%arg0: i32) -> (i32, i32) {
    %c0_i32 = arith.constant 0 : i32
    %c0_i32_0 = arith.constant 0 : i32
    return %arg0, %c0_i32 : i32, i32
  }
}

</mosaic_0001>

<bundles_post_ra>
// kernel: tpu_custom_call.1
= control target key start
LH: loop header
LB: loop body
LE: loop exit
PB: predicated region body
PF: predicated region fallthrough
CT: control target
= control target key end

     0   :  { %12 = vsyncpa [#allocation3], 0  ;;  %s1514_s0 = inlined_call_operand.vmem [shape: bf16[320,16], index: 0, kind: input, shape index: {}]   ;;  %s1515_s1 = inlined_call_operand.vmem [shape: bf16[16,128], index: 1, kind: input, shape index: {}]   ;;  %s1516_s2 = inlined_call_operand.vmem [shape: f32[1,128], index: 2, kind: input, shape index: {}]   ;;  %s1517_s3 = inlined_call_operand.vmem [shape: bf16[128,128], index: 3, kind: input, shape index: {}]   ;;  %s1518_s4 = inlined_call_operand.vmem [shape: f32[1,128], index: 4, kind: input, shape index: {}]   ;;  %s1519_s5 = inlined_call_operand.vmem [shape: bf16[128,128], index: 5, kind: input, shape index: {}]   ;;  %s1520_s6 = inlined_call_operand.vmem [shape: f32[1,128], index: 6, kind: input, shape index: {}]   ;;  %s1521_s7 = inlined_call_operand.hbm [shape: bf16[320,128], index: 7, kind: output, shape index: {}]  }
   0x1   :  { %14 = vsyncpa [#allocation3 + $0x1], 0  ;;  %s1265_s24 = smov 0   ;;  %s1267_s25 = smov 0  }
   0x2   :  { %s1269_s26 = smov 0   ;;  %s1271_s27 = smov 0  }
   0x3 LB: > { %s1286_s28 = sadd.s32 4294967295, %s1221_s27   ;;  %s885_s29 = sadd.s32 4294967294, %s1221_s27   ;;  %s1221_s27 = sphi %s1271_s27, %s1527_s27   ;;  %s1217_s26 = sphi %s1269_s26, %s1526_s26   ;;  %s1213_s25 = sphi %s1267_s25, %s1525_s25   ;;  %s1209_s24 = sphi %s1265_s24, %s1524_s24  }
   0x4   : > { %s1290_s30 = sadd.s32 1, %s1221_s27   ;;  %s179_s8 = sadd.s32 1, %s1217_s26 }
   0x5   : > { %s176_s9 = ssub.s32 %s1221_s27, %s1290_s30  ;;  %p189_p0 = scmp.ne.s32.totalorder %s1217_s26, %s1213_s25 }
   0x6   : > { %p177_p1 = scmp.eq.s32.totalorder %s176_s9, 0  ;;  %p190_p2 = scmp.eq.s32.totalorder %s1286_s28, 1 }
   0x7   : > { %p195_p3 = scmp.ne.s32.totalorder %s1213_s25, %s1209_s24  ;;  %p196_p4 = scmp.eq.s32.totalorder %s885_s29, 1 }
   0x8   : > { %s1301_s10 = scalar_select %p177_p1, %s1217_s26, %s179_s8  }
   0x9   : > { %p1303_p5 = por %p190_p2, %p189_p0  ;;  %p1307_p6 = por %p196_p4, %p195_p3 }
   0xa   : > { %p888_p7 = scmp.ge.s32.totalorder %s1221_s27, 1  ;;  %p241_p8 = scmp.lt.s32.totalorder %s1221_s27, 3 }
   0xc   : > { %p242_p9 = pnand %p888_p7, %p241_p8 }
   0xd   : > { %s273_s15 = smul.u32 (!%p242_p9), 20, %s1286_s28  ;;  %s270_s14 = sand.u32 (!%p242_p9), 1, %s1213_s25  }
   0xe   : > { %245 = sbr.rel (%p242_p9) target bundleno = 601 (0x259), region = 48  ;;  %s808_s8 = scalar_lea.sflag (!%p242_p9), [#allocation3], %s270_s14 }
   0xf   : > { %p274_p10 = scmp.lt.s32.totalorder (!%p242_p9), %s273_s15, 39  ;;  %s1114_s17 = smul.u32 (!%p242_p9), 80, %s270_s14 }
  0x10   : > { %s1038_s20 = smul.u32 (!%p242_p9), 80, %s1286_s28 }
  0x11   : > { %s1449_s18 = scalar_lea.vmem (!%p242_p9), [#allocation2], %s1114_s17 }
  0x12   : > { %s819_s23 = scalar_lea.hbm (!%p242_p9), %s1521_s7, %s1038_s20  ;;  %s820_s29 = sshll.u32 (!%p242_p9), %s1449_s18, 4  ;;  %s821_s29 = int_to_ptr.vmem [resolvable:$true] %s820_s29 }
  0x13   : > { %v1021_v0 = vld [vmem:[%s1515_s1] sm:$0xff]  ;;  %s1529_s15 = smov (!%p274_p10, %s273_s15), 39  ;;  %vm363_vm0 = vcmask 130048   ;;  %v1029_v6 = vld [vmem:[%s1517_s3 + $0x38] sm:$0xff]  ;;  %v1028_v8 = vld [vmem:[%s1517_s3 + $0x30] sm:$0xff] }
  0x14   : > { %401 = vmatpush.bf16.msra.mxu0 %v1021_v0  ;;  %s889_s16 = sshll.u32 %s1529_s15, 2  ;;  %551 = vmatpush.bf16.msra.mxu1 %v1029_v6  ;;  %v1027_v9 = vld [vmem:[%s1517_s3 + $0x28] sm:$0xff]  ;;  %v1026_v10 = vld [vmem:[%s1517_s3 + $0x20] sm:$0xff]  ;;  %v1025_v11 = vld [vmem:[%s1517_s3 + $0x18] sm:$0xff] }
  0x15   : > { %s1320_s19 = scalar_lea.vmem %s1514_s0, %s889_s16  ;;  %1098 = vmatpush.bf16.msra.mxu3 %v1029_v6  ;;  %v1024_v13 = vld [vmem:[%s1517_s3 + $0x10] sm:$0xff]  ;;  %v1023_v14 = vld [vmem:[%s1517_s3 + $0x8] sm:$0xff]  ;;  %v1022_v15 = vld [vmem:[%s1517_s3] sm:$0xff]  ;;  %s1179_s16 = scalar_lea.hbm %s1521_s7, 160 }
  0x16   : > { %v1011_v1 = vld [vmem:[%s1320_s19] sm:$0xff]  ;;  %v1012_v2 = vld [vmem:[%s1320_s19 + $0x8] sm:$0xff]  ;;  %v1013_v3 = vld [vmem:[%s1320_s19 + $0x10] sm:$0xff] }
  0x17   : > { %934 = vmatmul.msk.bf16.vlgmr.msra.gmra.mxu0 %vm363_vm0, %v1011_v1  ;;  %v1014_v4 = vld [vmem:[%s1320_s19 + $0x18] sm:$0xff]  ;;  %v1015_v5 = vld [vmem:[%s1320_s19 + $0x20] sm:$0xff]  ;;  %v1016_v7 = vld [vmem:[%s1320_s19 + $0x28] sm:$0xff] }
  0x18   : > { %552 = vmatpush.bf16.msra.mxu1 %v1028_v8  ;;  %v1017_v12 = vld [vmem:[%s1320_s19 + $0x30] sm:$0xff]  ;;  %v1018_v16 = vld [vmem:[%s1320_s19 + $0x38] sm:$0xff]  ;;  %v1019_v17 = vld [vmem:[%s1320_s19 + $0x40] sm:$0xff] }
  0x19   : > { %1099 = vmatpush.bf16.msra.mxu3 %v1028_v8  ;;  %v1366_v19 = vld [vmem:[%s1516_s2] ss:$0 sm:$0xff]  ;;  %v1020_v26 = vld [vmem:[%s1320_s19 + $0x48] sm:$0xff]  ;;  %v1037_v59 = vld [vmem:[%s1519_s5 + $0x38] sm:$0xff]  ;;  %s822_s19 = sshll.u32 %s819_s23, 4  ;;  %s823_s19 = int_to_ptr.hbm [resolvable:$true] %s822_s19 }
  0x1a   : > { %708 = vmatpush.bf16.msra.mxu2 %v1037_v59  ;;  %v1036_v63 = vld [vmem:[%s1519_s5 + $0x30] sm:$0xff]  ;;  %v1035_v1 = vld [vmem:[%s1519_s5 + $0x28] sm:$0xff]  ;;  %v1033_v6 = vld [vmem:[%s1519_s5 + $0x18] sm:$0xff]  ;;  %s1173_s9 = sshra.s32 %s823_s19, 4  ;;  %s1174_s9 = int_to_ptr.hbm [resolvable:$true] %s1173_s9 }
  0x1b   : > { %s1175_s28 = scalar_lea.hbm %s1174_s9, 80  ;;  %p1180_p0 = scmp.lt.s32.totalorder %s1174_s9, %s1521_s7 }
  0x1c   : > { %553 = vmatpush.bf16.msra.mxu1 %v1027_v9  ;;  %p1176_p11 = scmp.ne.s32.totalorder %s1174_s9, %s1175_s28  ;;  %p1181_p1 = scmp.lt.s32.totalorder %s1179_s16, %s1175_s28 }
  0x1d   : > { %1100 = vmatpush.bf16.msra.mxu3 %v1027_v9 }
  0x1e   : > { %709 = vmatpush.bf16.msra.mxu2 %v1036_v63  ;;  %p1177_p12 = pnand %p1176_p11, %p1303_p5  ;;  %p1182_p2 = por %p1181_p1, %p1180_p0 }
  0x20   : > { %554 = vmatpush.bf16.msra.mxu1 %v1026_v10  ;;  %p1178_p13 = pneg %p1177_p12 }
  0x21   : > { %1101 = vmatpush.bf16.msra.mxu3 %v1026_v10  ;;  %v1032_v10 = vld [vmem:[%s1519_s5 + $0x10] sm:$0xff] }
  0x22   : > { %710 = vmatpush.bf16.msra.mxu2 %v1035_v1  ;;  %p1183_p3 = pnand %p1182_p2, %p1178_p13 }
  0x24   : > { %555 = vmatpush.bf16.msra.mxu1 %v1025_v11 }
  0x25   : > { %1102 = vmatpush.bf16.msra.mxu3 %v1025_v11 }
  0x27   : > { %935 = vmatmul.msk.bf16.gmra.mxu0 %vm363_vm0, %v1012_v2  ;;  %v1034_v2 = vld [vmem:[%s1519_s5 + $0x20] sm:$0xff] }
  0x28   : > { %556 = vmatpush.bf16.msra.mxu1 %v1024_v13  ;;  %711 = vmatpush.bf16.msra.mxu2 %v1034_v2 }
  0x29   : > { %1103 = vmatpush.bf16.msra.mxu3 %v1024_v13  ;;  %v1030_v13 = vld [vmem:[%s1519_s5] sm:$0xff] }
  0x2c   : > { %557 = vmatpush.bf16.msra.mxu1 %v1023_v14  ;;  %712 = vmatpush.bf16.msra.mxu2 %v1033_v6 }
  0x2d   : > { %1104 = vmatpush.bf16.msra.mxu3 %v1023_v14 }
  0x30   : > { %558 = vmatpush.bf16.msra.mxu1 %v1022_v15  ;;  %713 = vmatpush.bf16.msra.mxu2 %v1032_v10 }
  0x31   : > { %1105 = vmatpush.bf16.msra.mxu3 %v1022_v15 }
  0x35   : > { %1106 = vmatpush.bf16.msrb.mxu3 %v1037_v59 }
  0x37   : > { %936 = vmatmul.msk.bf16.gmra.mxu0 %vm363_vm0, %v1013_v3 }
  0x39   : > { %1107 = vmatpush.bf16.msrb.mxu3 %v1036_v63 }
  0x3d   : > { %1108 = vmatpush.bf16.msrb.mxu3 %v1035_v1 }
  0x41   : > { %1109 = vmatpush.bf16.msrb.mxu3 %v1034_v2 }
  0x45   : > { %1110 = vmatpush.bf16.msrb.mxu3 %v1033_v6 }
  0x47   : > { %937 = vmatmul.msk.bf16.gmra.mxu0 %vm363_vm0, %v1014_v4 }
  0x49   : > { %1111 = vmatpush.bf16.msrb.mxu3 %v1032_v10 }
  0x57   : > { %938 = vmatmul.msk.bf16.gmra.mxu0 %vm363_vm0, %v1015_v5 }
  0x67   : > { %939 = vmatmul.msk.bf16.gmra.mxu0 %vm363_vm0, %v1016_v7 }
  0x77   : > { %940 = vmatmul.msk.bf16.gmra.mxu0 %vm363_vm0, %v1017_v12  ;;  %v1031_v12 = vld [vmem:[%s1519_s5 + $0x8] sm:$0xff] }
  0x78   : > { %714 = vmatpush.bf16.msra.mxu2 %v1031_v12  ;;  %1112 = vmatpush.bf16.msrb.mxu3 %v1031_v12 }
  0x7c   : > { %715 = vmatpush.bf16.msra.mxu2 %v1030_v13  ;;  %1113 = vmatpush.bf16.msrb.mxu3 %v1030_v13 }
  0x87   : > { %941 = vmatmul.msk.bf16.gmra.mxu0 %vm363_vm0, %v1018_v16 }
  0x94   : > { %v403_v18 = vpop.f32.mrf.mxu0 }
  0x95   : > { %v404_v20 = vadd.f32 %v1366_v19, %v403_v18 }
  0x97   : > { %942 = vmatmul.msk.bf16.gmra.mxu0 %vm363_vm0, %v1019_v17  ;;  %v453_v23 = vmax.f32 %v404_v20, 0.0 }
  0x9c   : > { %v405_v21 = vpop.f32.mrf.mxu0 }
  0x9d   : > { %v406_v22 = vadd.f32 %v1366_v19, %v405_v21 }
  0x9f   : > { %v454_v24 = vmax.f32 %v406_v22, 0.0 }
  0xa1   : > { %v473_v25 = vpack.c.bf16 %v454_v24, %v453_v23 }
  0xa3   : > { %559 = vmatmul.bf16.vlgmr.msra.gmra.mxu1 %v473_v25 }
  0xa4   : > { %v408_v27 = vpop.f32.mrf.mxu0 }
  0xa5   : > { %v409_v28 = vadd.f32 %v1366_v19, %v408_v27 }
  0xa7   : > { %943 = vmatmul.msk.bf16.gmra.mxu0 %vm363_vm0, %v1020_v26  ;;  %v455_v31 = vmax.f32 %v409_v28, 0.0 }
  0xac   : > { %v410_v29 = vpop.f32.mrf.mxu0 }
  0xad   : > { %v411_v30 = vadd.f32 %v1366_v19, %v410_v29  ;;  %v1416_v29 = vld [vmem:[%s1518_s4] ss:$0 sm:$0xff] }
  0xaf   : > { %v456_v32 = vmax.f32 %v411_v30, 0.0 }
  0xb1   : > { %v474_v33 = vpack.c.bf16 %v456_v32, %v455_v31 }
  0xb3   : > { %564 = vmatmul.bf16.gmra.mxu1 %v474_v33 }
  0xb4   : > { %v413_v34 = vpop.f32.mrf.mxu0 }
  0xb5   : > { %v414_v35 = vadd.f32 %v1366_v19, %v413_v34 }
  0xb7   : > { %v457_v38 = vmax.f32 %v414_v35, 0.0 }
  0xbc   : > { %v415_v36 = vpop.f32.mrf.mxu0 }
  0xbd   : > { %v416_v37 = vadd.f32 %v1366_v19, %v415_v36 }
  0xbf   : > { %v458_v39 = vmax.f32 %v416_v37, 0.0 }
  0xc1   : > { %v475_v40 = vpack.c.bf16 %v458_v39, %v457_v38 }
  0xc3   : > { %569 = vmatmul.bf16.gmra.mxu1 %v475_v40 }
  0xc4   : > { %v418_v41 = vpop.f32.mrf.mxu0 }
  0xc5   : > { %v419_v42 = vadd.f32 %v1366_v19, %v418_v41 }
  0xc7   : > { %v459_v45 = vmax.f32 %v419_v42, 0.0 }
  0xcc   : > { %v420_v43 = vpop.f32.mrf.mxu0 }
  0xcd   : > { %v421_v44 = vadd.f32 %v1366_v19, %v420_v43 }
  0xcf   : > { %v460_v46 = vmax.f32 %v421_v44, 0.0 }
  0xd1   : > { %v476_v47 = vpack.c.bf16 %v460_v46, %v459_v45 }
  0xd3   : > { %574 = vmatmul.bf16.gmra.mxu1 %v476_v47 }
  0xd4   : > { %v423_v48 = vpop.f32.mrf.mxu0 }
  0xd5   : > { %v424_v49 = vadd.f32 %v1366_v19, %v423_v48 }
  0xd7   : > { %v461_v52 = vmax.f32 %v424_v49, 0.0 }
  0xdc   : > { %v425_v50 = vpop.f32.mrf.mxu0 }
  0xdd   : > { %v426_v51 = vadd.f32 %v1366_v19, %v425_v50 }
  0xdf   : > { %v462_v53 = vmax.f32 %v426_v51, 0.0 }
  0xe1   : > { %v477_v54 = vpack.c.bf16 %v462_v53, %v461_v52 }
  0xe3   : > { %579 = vmatmul.bf16.gmra.mxu1 %v477_v54 }
  0xe4   : > { %v428_v55 = vpop.f32.mrf.mxu0 }
  0xe5   : > { %v429_v56 = vadd.f32 %v1366_v19, %v428_v55 }
  0xe7   : > { %v463_v60 = vmax.f32 %v429_v56, 0.0 }
  0xec   : > { %v430_v57 = vpop.f32.mrf.mxu0 }
  0xed   : > { %v431_v58 = vadd.f32 %v1366_v19, %v430_v57 }
  0xef   : > { %v464_v61 = vmax.f32 %v431_v58, 0.0 }
  0xf1   : > { %v478_v62 = vpack.c.bf16 %v464_v61, %v463_v60 }
  0xf3   : > { %584 = vmatmul.bf16.gmra.mxu1 %v478_v62 }
  0xf4   : > { %v433_v0 = vpop.f32.mrf.mxu0 }
  0xf5   : > { %v434_v3 = vadd.f32 %v1366_v19, %v433_v0 }
  0xf7   : > { %v465_v7 = vmax.f32 %v434_v3, 0.0 }
  0xfc   : > { %v435_v4 = vpop.f32.mrf.mxu0 }
  0xfd   : > { %v436_v5 = vadd.f32 %v1366_v19, %v435_v4 }
  0xff   : > { %v466_v8 = vmax.f32 %v436_v5, 0.0 }
 0x101   : > { %v479_v9 = vpack.c.bf16 %v466_v8, %v465_v7 }
 0x103   : > { %589 = vmatmul.bf16.gmra.mxu1 %v479_v9 }
 0x104   : > { %v438_v11 = vpop.f32.mrf.mxu0 }
 0x105   : > { %v439_v14 = vadd.f32 %v1366_v19, %v438_v11 }
 0x107   : > { %v467_v17 = vmax.f32 %v439_v14, 0.0 }
 0x10c   : > { %v440_v15 = vpop.f32.mrf.mxu0 }
 0x10d   : > { %v441_v16 = vadd.f32 %v1366_v19, %v440_v15 }
 0x10f   : > { %v468_v18 = vmax.f32 %v441_v16, 0.0 }
 0x111   : > { %v480_v20 = vpack.c.bf16 %v468_v18, %v467_v17 }
 0x113   : > { %594 = vmatmul.bf16.gmra.mxu1 %v480_v20 }
 0x114   : > { %v443_v21 = vpop.f32.mrf.mxu0 }
 0x115   : > { %v444_v22 = vadd.f32 %v1366_v19, %v443_v21 }
 0x117   : > { %v469_v25 = vmax.f32 %v444_v22, 0.0 }
 0x11c   : > { %v445_v23 = vpop.f32.mrf.mxu0 }
 0x11d   : > { %v446_v24 = vadd.f32 %v1366_v19, %v445_v23 }
 0x11f   : > { %v470_v26 = vmax.f32 %v446_v24, 0.0 }
 0x120   : > { %v560_v27 = vpop.f32.mrf.mxu1 }
 0x121   : > { %v481_v28 = vpack.c.bf16 %v470_v26, %v469_v25  ;;  %v561_v31 = vadd.f32 %v1416_v29, %v560_v27 }
 0x123   : > { %599 = vmatmul.bf16.vlgmr.msra.gmra.mxu3 %v481_v28  ;;  %v610_v34 = vmax.f32 %v561_v31, 0.0 }
 0x124   : > { %v448_v30 = vpop.f32.mrf.mxu0 }
 0x125   : > { %v449_v35 = vadd.f32 %v1366_v19, %v448_v30 }
 0x127   : > { %v471_v40 = vmax.f32 %v449_v35, 0.0 }
 0x128   : > { %v562_v32 = vpop.f32.mrf.mxu1 }
 0x129   : > { %v563_v33 = vadd.f32 %v1416_v29, %v562_v32 }
 0x12b   : > { %v611_v36 = vmax.f32 %v563_v33, 0.0 }
 0x12c   : > { %v450_v37 = vpop.f32.mrf.mxu0 }
 0x12d   : > { %v451_v38 = vadd.f32 %v1366_v19, %v450_v37  ;;  %v630_v39 = vpack.c.bf16 %v611_v36, %v610_v34 }
 0x12f   : > { %v472_v41 = vmax.f32 %v451_v38, 0.0  ;;  %716 = vmatmul.bf16.vlgmr.msra.gmra.mxu2 %v630_v39  ;;  %v1442_v38 = vld [vmem:[%s1520_s6] ss:$0 sm:$0xff] }
 0x130   : > { %v565_v42 = vpop.f32.mrf.mxu1 }
 0x131   : > { %v482_v43 = vpack.c.bf16 %v472_v41, %v471_v40  ;;  %v566_v44 = vadd.f32 %v1416_v29, %v565_v42 }
 0x133   : > { %604 = vmatmul.bf16.gmra.mxu3 %v482_v43  ;;  %v612_v47 = vmax.f32 %v566_v44, 0.0 }
 0x138   : > { %v567_v45 = vpop.f32.mrf.mxu1 }
 0x139   : > { %v568_v46 = vadd.f32 %v1416_v29, %v567_v45 }
 0x13b   : > { %v613_v48 = vmax.f32 %v568_v46, 0.0 }
 0x13d   : > { %v631_v49 = vpack.c.bf16 %v613_v48, %v612_v47 }
 0x13f   : > { %721 = vmatmul.bf16.gmra.mxu2 %v631_v49 }
 0x140   : > { %v570_v50 = vpop.f32.mrf.mxu1 }
 0x141   : > { %v571_v51 = vadd.f32 %v1416_v29, %v570_v50 }
 0x143   : > { %v614_v53 = vmax.f32 %v571_v51, 0.0 }
 0x148   : > { %v572_v19 = vpop.f32.mrf.mxu1 }
 0x149   : > { %v573_v52 = vadd.f32 %v1416_v29, %v572_v19 }
 0x14b   : > { %v615_v54 = vmax.f32 %v573_v52, 0.0 }
 0x14d   : > { %v632_v55 = vpack.c.bf16 %v615_v54, %v614_v53 }
 0x14f   : > { %726 = vmatmul.bf16.gmra.mxu2 %v632_v55 }
 0x150   : > { %v575_v56 = vpop.f32.mrf.mxu1 }
 0x151   : > { %v576_v57 = vadd.f32 %v1416_v29, %v575_v56 }
 0x153   : > { %v616_v60 = vmax.f32 %v576_v57, 0.0 }
 0x158   : > { %v577_v58 = vpop.f32.mrf.mxu1 }
 0x159   : > { %v578_v59 = vadd.f32 %v1416_v29, %v577_v58 }
 0x15b   : > { %v617_v61 = vmax.f32 %v578_v59, 0.0 }
 0x15d   : > { %v633_v62 = vpack.c.bf16 %v617_v61, %v616_v60 }
 0x15f   : > { %731 = vmatmul.bf16.gmra.mxu2 %v633_v62 }
 0x160   : > { %v580_v63 = vpop.f32.mrf.mxu1 }
 0x161   : > { %v581_v0 = vadd.f32 %v1416_v29, %v580_v63 }
 0x163   : > { %v618_v3 = vmax.f32 %v581_v0, 0.0 }
 0x168   : > { %v582_v1 = vpop.f32.mrf.mxu1 }
 0x169   : > { %v583_v2 = vadd.f32 %v1416_v29, %v582_v1 }
 0x16b   : > { %v619_v4 = vmax.f32 %v583_v2, 0.0 }
 0x16d   : > { %v634_v5 = vpack.c.bf16 %v619_v4, %v618_v3 }
 0x16f   : > { %736 = vmatmul.bf16.gmra.mxu2 %v634_v5 }
 0x170   : > { %v585_v6 = vpop.f32.mrf.mxu1 }
 0x171   : > { %v586_v7 = vadd.f32 %v1416_v29, %v585_v6 }
 0x173   : > { %v620_v10 = vmax.f32 %v586_v7, 0.0 }
 0x178   : > { %v587_v8 = vpop.f32.mrf.mxu1 }
 0x179   : > { %v588_v9 = vadd.f32 %v1416_v29, %v587_v8 }
 0x17b   : > { %v621_v11 = vmax.f32 %v588_v9, 0.0 }
 0x17d   : > { %v635_v12 = vpack.c.bf16 %v621_v11, %v620_v10 }
 0x17f   : > { %741 = vmatmul.bf16.gmra.mxu2 %v635_v12 }
 0x180   : > { %v590_v13 = vpop.f32.mrf.mxu1 }
 0x181   : > { %v591_v14 = vadd.f32 %v1416_v29, %v590_v13 }
 0x183   : > { %v622_v17 = vmax.f32 %v591_v14, 0.0 }
 0x188   : > { %v592_v15 = vpop.f32.mrf.mxu1 }
 0x189   : > { %v593_v16 = vadd.f32 %v1416_v29, %v592_v15 }
 0x18b   : > { %v623_v18 = vmax.f32 %v593_v16, 0.0 }
 0x18d   : > { %v636_v20 = vpack.c.bf16 %v623_v18, %v622_v17 }
 0x18f   : > { %746 = vmatmul.bf16.gmra.mxu2 %v636_v20 }
 0x190   : > { %v595_v21 = vpop.f32.mrf.mxu1 }
 0x191   : > { %v596_v22 = vadd.f32 %v1416_v29, %v595_v21 }
 0x193   : > { %v624_v25 = vmax.f32 %v596_v22, 0.0 }
 0x198   : > { %v597_v23 = vpop.f32.mrf.mxu1 }
 0x199   : > { %v598_v24 = vadd.f32 %v1416_v29, %v597_v23 }
 0x19b   : > { %v625_v26 = vmax.f32 %v598_v24, 0.0 }
 0x19d   : > { %v637_v27 = vpack.c.bf16 %v625_v26, %v624_v25 }
 0x19f   : > { %751 = vmatmul.bf16.gmra.mxu2 %v637_v27 }
 0x1a6   : > { %v600_v28 = vpop.f32.mrf.mxu3 }
 0x1a7   : > { %v601_v30 = vadd.f32 %v1416_v29, %v600_v28 }
 0x1a9   : > { %v626_v33 = vmax.f32 %v601_v30, 0.0 }
 0x1ae   : > { %v602_v31 = vpop.f32.mrf.mxu3 }
 0x1af   : > { %v603_v32 = vadd.f32 %v1416_v29, %v602_v31 }
 0x1b1   : > { %v627_v34 = vmax.f32 %v603_v32, 0.0 }
 0x1b2   : > { %v717_v35 = vpop.f32.mrf.mxu2 }
 0x1b3   : > { %v638_v36 = vpack.c.bf16 %v627_v34, %v626_v33  ;;  %v718_v40 = vadd.f32 %v1442_v38, %v717_v35 }
 0x1b5   : > { %756 = vmatmul.bf16.vlgmr.msrb.gmra.mxu3 %v638_v36 }
 0x1b6   : > { %v605_v37 = vpop.f32.mrf.mxu3 }
 0x1b7   : > { %v606_v42 = vadd.f32 %v1416_v29, %v605_v37 }
 0x1b9   : > { %v628_v46 = vmax.f32 %v606_v42, 0.0 }
 0x1ba   : > { %v719_v39 = vpop.f32.mrf.mxu2 }
 0x1bb   : > { %v720_v41 = vadd.f32 %v1442_v38, %v719_v39 }
 0x1bd   : > { %v1042_v43 = vpack.c.bf16 %v720_v41, %v718_v40 }
 0x1be   : > { %v607_v44 = vpop.f32.mrf.mxu3 }
 0x1bf   : > { %1043 = vst [vmem:[%s1449_s18] sm:$0xff] %v1042_v43   ;;  %v608_v45 = vadd.f32 %v1416_v29, %v607_v44 }
 0x1c1   : > { %v629_v47 = vmax.f32 %v608_v45, 0.0 }
 0x1c2   : > { %v722_v48 = vpop.f32.mrf.mxu2 }
 0x1c3   : > { %v639_v49 = vpack.c.bf16 %v629_v47, %v628_v46  ;;  %v723_v51 = vadd.f32 %v1442_v38, %v722_v48 }
 0x1c5   : > { %761 = vmatmul.bf16.gmra.mxu3 %v639_v49 }
 0x1ca   : > { %v724_v50 = vpop.f32.mrf.mxu2 }
 0x1cb   : > { %v725_v19 = vadd.f32 %v1442_v38, %v724_v50 }
 0x1cd   : > { %v1047_v52 = vpack.c.bf16 %v725_v19, %v723_v51 }
 0x1cf   : > { %1089 = vst [vmem:[%s1449_s18 + $0x8] sm:$0xff] %v1047_v52  }
 0x1d2   : > { %v727_v53 = vpop.f32.mrf.mxu2 }
 0x1d3   : > { %v728_v55 = vadd.f32 %v1442_v38, %v727_v53 }
 0x1da   : > { %v729_v54 = vpop.f32.mrf.mxu2 }
 0x1db   : > { %v730_v29 = vadd.f32 %v1442_v38, %v729_v54 }
 0x1dd   : > { %v1052_v56 = vpack.c.bf16 %v730_v29, %v728_v55 }
 0x1df   : > { %1090 = vst [vmem:[%s1449_s18 + $0x10] sm:$0xff] %v1052_v56  }
 0x1e2   : > { %v732_v57 = vpop.f32.mrf.mxu2 }
 0x1e3   : > { %v733_v59 = vadd.f32 %v1442_v38, %v732_v57 }
 0x1ea   : > { %v734_v58 = vpop.f32.mrf.mxu2 }
 0x1eb   : > { %v735_v60 = vadd.f32 %v1442_v38, %v734_v58 }
 0x1ed   : > { %v1057_v61 = vpack.c.bf16 %v735_v60, %v733_v59 }
 0x1ef   : > { %1091 = vst [vmem:[%s1449_s18 + $0x18] sm:$0xff] %v1057_v61  }
 0x1f2   : > { %v737_v62 = vpop.f32.mrf.mxu2 }
 0x1f3   : > { %v738_v0 = vadd.f32 %v1442_v38, %v737_v62 }
 0x1fa   : > { %v739_v63 = vpop.f32.mrf.mxu2 }
 0x1fb   : > { %v740_v1 = vadd.f32 %v1442_v38, %v739_v63 }
 0x1fd   : > { %v1062_v2 = vpack.c.bf16 %v740_v1, %v738_v0 }
 0x1ff   : > { %1092 = vst [vmem:[%s1449_s18 + $0x20] sm:$0xff] %v1062_v2  }
 0x202   : > { %v742_v3 = vpop.f32.mrf.mxu2 }
 0x203   : > { %v743_v5 = vadd.f32 %v1442_v38, %v742_v3 }
 0x20a   : > { %v744_v4 = vpop.f32.mrf.mxu2 }
 0x20b   : > { %v745_v6 = vadd.f32 %v1442_v38, %v744_v4 }
 0x20d   : > { %v1067_v7 = vpack.c.bf16 %v745_v6, %v743_v5 }
 0x20f   : > { %1093 = vst [vmem:[%s1449_s18 + $0x28] sm:$0xff] %v1067_v7  }
 0x212   : > { %v747_v8 = vpop.f32.mrf.mxu2 }
 0x213   : > { %v748_v10 = vadd.f32 %v1442_v38, %v747_v8 }
 0x21a   : > { %v749_v9 = vpop.f32.mrf.mxu2 }
 0x21b   : > { %v750_v11 = vadd.f32 %v1442_v38, %v749_v9 }
 0x21d   : > { %v1072_v12 = vpack.c.bf16 %v750_v11, %v748_v10 }
 0x21f   : > { %1094 = vst [vmem:[%s1449_s18 + $0x30] sm:$0xff] %v1072_v12  }
 0x222   : > { %v752_v13 = vpop.f32.mrf.mxu2 }
 0x223   : > { %v753_v15 = vadd.f32 %v1442_v38, %v752_v13 }
 0x22a   : > { %v754_v14 = vpop.f32.mrf.mxu2 }
 0x22b   : > { %v755_v16 = vadd.f32 %v1442_v38, %v754_v14 }
 0x22d   : > { %v1077_v17 = vpack.c.bf16 %v755_v16, %v753_v15 }
 0x22f   : > { %1095 = vst [vmem:[%s1449_s18 + $0x38] sm:$0xff] %v1077_v17  }
 0x238   : > { %v757_v18 = vpop.f32.mrf.mxu3 }
 0x239   : > { %v758_v21 = vadd.f32 %v1442_v38, %v757_v18 }
 0x240   : > { %v759_v20 = vpop.f32.mrf.mxu3 }
 0x241   : > { %v760_v22 = vadd.f32 %v1442_v38, %v759_v20 }
 0x243   : > { %v1082_v23 = vpack.c.bf16 %v760_v22, %v758_v21 }
 0x245   : > { %1096 = vst [vmem:[%s1449_s18 + $0x40] sm:$0xff] %v1082_v23  }
 0x248   : > { %v762_v24 = vpop.f32.mrf.mxu3 }
 0x249   : > { %v763_v26 = vadd.f32 %v1442_v38, %v762_v24 }
 0x250   : > { %v764_v25 = vpop.f32.mrf.mxu3 }
 0x251   : > { %v765_v27 = vadd.f32 %v1442_v38, %v764_v25 }
 0x253   : > { %v1087_v28 = vpack.c.bf16 %v765_v27, %v763_v26 }
 0x255   : > { %1097 = vst [vmem:[%s1449_s18 + $0x48] sm:$0xff] %v1087_v28  }
 0x256   : > { %1186 = shalt.err (!%p1183_p3)
}
 0x257   : > { %s1223_s14 = smov 64   ;;  %s1224_s18 = smov 4  }
 0x258   : > { %1115 = dma.vmem_to_hbm [thread:$0]  (%p1303_p5), %s821_s29, 1280, %s823_s19, %s808_s8, %s1223_s14, %s1223_s14, %s1224_s18  }
 0x259 PF: > { %p1121_p4 = scmp.ge.s32.totalorder %s1221_s27, 2  ;;  %s837_s21 = sand.u32 1, %s1209_s24  }
 0x25a   : > { %s838_s22 = scalar_lea.sflag [#allocation3], %s837_s21 }
 0x25b   : > { %p1118_p7 = pnand %p1121_p4, %p1307_p6 }
 0x25d   : > { %p1119_p8 = pneg %p1118_p7 }
 0x25f   : > { %1204 = dma.done.wait (%p1119_p8), %s838_s22, 1280  }
 0x260   : > { %1206 = vsyncadd (%p1119_p8), %s838_s22, 4294966016  ;;  %p17_p9 = scmp.ge.s32.totalorder %s1290_s30, 4   ;;  %s1524_s24 = smov %s1213_s25 }
 0x261   : > { %s1525_s25 = smov %s1217_s26  ;;  %s1526_s26 = smov %s1301_s10 }
 0x262   : > { %s1527_s27 = smov %s1290_s30  ;;  %19 = sbr.rel (!%p17_p9) target bundleno = 3 (0x3), region = 83 }
 0x267   :  { %844 = vsyncpa [#allocation3], 1 }
 0x268   :  { %846 = vsyncpa [#allocation3 + $0x1], 1 }

</bundles_post_ra>
